<compile_context>
chip_gen: v6e
topology: v6e:2x2x1
jax: 0.10.0
libtpu: 0.0.40
codegen_flags: <defaults>
</compile_context>

<pallas_src>
import math
from functools import partial

import jax
import jax.numpy as jnp
from jax.experimental import pallas as pl
from jax.experimental.pallas import tpu as pltpu


# ----------------------------------------------------------------------------
# Kernels
# ----------------------------------------------------------------------------

def _att2in_cell_kernel(emb_ref, h_ref, c_ref, att_ref, w_ref, u_ref, zc_ref,
                        b_ref, h_out_ref, c_out_ref, *, hidden_size):
    """Single decode step: three small MXU matmuls + elementwise gates."""
    H = hidden_size

    pre = (jnp.dot(emb_ref[...], w_ref[...], preferred_element_type=jnp.float32)
           + jnp.dot(h_ref[...], u_ref[...], preferred_element_type=jnp.float32)
           + b_ref[...])                                            # [B, 4H]
    att_c = jnp.dot(att_ref[...], zc_ref[...],
                    preferred_element_type=jnp.float32)             # [B, H]

    i_g = jax.nn.sigmoid(pre[:, 0 * H:1 * H])
    f_g = jax.nn.sigmoid(pre[:, 1 * H:2 * H])
    c_hat = jnp.tanh(pre[:, 2 * H:3 * H] + att_c)
    o_g = jax.nn.sigmoid(pre[:, 3 * H:4 * H])

    c_new = f_g * c_ref[...].astype(jnp.float32) + i_g * c_hat
    h_new = o_g * jnp.tanh(c_new)

    h_out_ref[...] = h_new.astype(h_out_ref.dtype)
    c_out_ref[...] = c_new.astype(c_out_ref.dtype)


def _att2in_seq_kernel(emb_ref, att_ref, h0_ref, c0_ref, w_ref, u_ref, zc_ref,
                       b_ref, h_seq_ref, hT_ref, cT_ref, h_st, c_st,
                       *, hidden_size, chunk, batch):
    """CT timesteps per grid step.  Weights are VMEM-resident (constant index
    maps => single DMA); h/c live in f32 VMEM scratch across grid steps.

    The whole input path (emb @ W + b, att @ z_c) is hoisted out of the serial
    loop as chunk-wide matmuls, so only h @ U + gates sit on the t chain."""
    H, CT, B = hidden_size, chunk, batch
    t = pl.program_id(0)

    @pl.when(t == 0)
    def _():
        h_st[...] = h0_ref[...].astype(jnp.float32)
        c_st[...] = c0_ref[...].astype(jnp.float32)

    # ---- Hoisted input projections: one [CT*B, E]@[E,4H] and one [CT*B,H]@[H,H]
    x_pre = (jnp.dot(emb_ref[...], w_ref[...], preferred_element_type=jnp.float32)
             + b_ref[...])                                          # [CT*B, 4H]
    att_c = jnp.dot(att_ref[...], zc_ref[...],
                    preferred_element_type=jnp.float32)             # [CT*B, H]

    # ---- Serial recurrence (fully unrolled; CT is a small static int).
    h = h_st[...]
    c = c_st[...]
    for i in range(CT):
        lo, hi = i * B, (i + 1) * B
        pre = x_pre[lo:hi] + jnp.dot(h, u_ref[...],
                                     preferred_element_type=jnp.float32)
        i_g = jax.nn.sigmoid(pre[:, 0 * H:1 * H])
        f_g = jax.nn.sigmoid(pre[:, 1 * H:2 * H])
        c_hat = jnp.tanh(pre[:, 2 * H:3 * H] + att_c[lo:hi])
        o_g = jax.nn.sigmoid(pre[:, 3 * H:4 * H])
        c = f_g * c + i_g * c_hat
        h = o_g * jnp.tanh(c)
        h_seq_ref[lo:hi, :] = h.astype(h_seq_ref.dtype)

    h_st[...] = h
    c_st[...] = c

    # Final state is emitted once, at the last chunk only.
    @pl.when(t == pl.num_programs(0) - 1)
    def _():
        hT_ref[...] = h.astype(hT_ref.dtype)
        cT_ref[...] = c.astype(cT_ref.dtype)


# ----------------------------------------------------------------------------
# Wrappers
# ----------------------------------------------------------------------------

def att2in_lstm_cell(embedded, states, attended, params, *, alias_states=False):
    """Single forward step (mirrors Att2InLSTMCell.forward).

    embedded: [B, E]; states: (h, c) each [B, H]; attended: [B, H].
    With alias_states=True, h and c are updated in place when donated
    (decode-loop usage).  Prefer att2in_lstm_sequence when T > 1.
    """
    h, c = states
    B, H = h.shape

    vmem = pl.BlockSpec(memory_space=pltpu.MemorySpace.VMEM)
    kwargs = {}
    if alias_states:
        # h (input 1) -> h_out (output 0);  c (input 2) -> c_out (output 1).
        kwargs["input_output_aliases"] = {1: 0, 2: 1}

    h_new, c_new = pl.pallas_call(
        partial(_att2in_cell_kernel, hidden_size=H),
        out_shape=(jax.ShapeDtypeStruct((B, H), h.dtype),
                   jax.ShapeDtypeStruct((B, H), c.dtype)),
        in_specs=[vmem] * 8,
        out_specs=(vmem, vmem),
        **kwargs,
    )(embedded, h, c, attended,
      params["W"], params["U"], params["z_c"], params["b"])
    return h_new, c_new


def _pick_chunk(T, requested):
    ct = max(1, min(requested, T))
    while T % ct:
        ct -= 1
    return ct


def att2in_lstm_sequence(embedded_seq, states, attended_seq, params, *,
                         chunk=16):
    """Run T recurrent steps in ONE pallas_call with VMEM-resident weights.

    embedded_seq: [T, B, E]; attended_seq: [T, B, H]; states: (h0, c0) [B, H].
    Returns (h_seq [T, B, H], (h_T, c_T)).
    """
    h0, c0 = states
    T, B, E = embedded_seq.shape
    H = h0.shape[1]
    CT = _pick_chunk(T, chunk)
    n_chunks = T // CT

    # Leading-dim merges are free (contiguous reshape), unlike the old concat.
    emb_flat = embedded_seq.reshape(T * B, E)
    att_flat = attended_seq.reshape(T * B, H)
    W, U, zc, b = params["W"], params["U"], params["z_c"], params["b"]

    grid_spec = pltpu.PrefetchScalarGridSpec(
        num_scalar_prefetch=0,
        grid=(n_chunks,),
        in_specs=[
            pl.BlockSpec((CT * B, E), lambda t: (t, 0)),     # embedded, per chunk
            pl.BlockSpec((CT * B, H), lambda t: (t, 0)),     # attended, per chunk
            pl.BlockSpec((B, H), lambda t: (0, 0)),          # h0 (fetched once)
            pl.BlockSpec((B, H), lambda t: (0, 0)),          # c0 (fetched once)
            pl.BlockSpec((E, 4 * H), lambda t: (0, 0)),      # W  resident
            pl.BlockSpec((H, 4 * H), lambda t: (0, 0)),      # U  resident
            pl.BlockSpec((H, H), lambda t: (0, 0)),          # z_c resident
            pl.BlockSpec((1, 4 * H), lambda t: (0, 0)),      # b  resident
        ],
        out_specs=(
            pl.BlockSpec((CT * B, H), lambda t: (t, 0)),     # h per step
            pl.BlockSpec((B, H), lambda t: (0, 0)),          # h_T (last chunk)
            pl.BlockSpec((B, H), lambda t: (0, 0)),          # c_T (last chunk)
        ),
        scratch_shapes=[pltpu.VMEM((B, H), jnp.float32),     # h state
                        pltpu.VMEM((B, H), jnp.float32)],    # c state
    )

    h_seq_flat, h_T, c_T = pl.pallas_call(
        partial(_att2in_seq_kernel, hidden_size=H, chunk=CT, batch=B),
        grid_spec=grid_spec,
        out_shape=(jax.ShapeDtypeStruct((T * B, H), h0.dtype),
                   jax.ShapeDtypeStruct((B, H), h0.dtype),
                   jax.ShapeDtypeStruct((B, H), c0.dtype)),
        compiler_params=pltpu.CompilerParams(
            dimension_semantics=("arbitrary",),              # recurrence in t
            vmem_limit_bytes=48 * 1024 * 1024),
    )(emb_flat, att_flat, h0, c0, W, U, zc, b)

    return h_seq_flat.reshape(T, B, H), (h_T, c_T)


# ----------------------------------------------------------------------------
# Parameter init (matches PyTorch reset_parameters)
# ----------------------------------------------------------------------------

def init_params(key, input_size, hidden_size, dtype=jnp.float32):
    """Each weight ~ U(-1/sqrt(size(0)), +1/sqrt(size(0))). Gate order i,f,c,o."""
    keys = jax.random.split(key, 13)
    ki = iter(keys)

    def unif(k, shape, fan):
        stdv = 1.0 / math.sqrt(fan)
        return jax.random.uniform(k, shape, dtype, minval=-stdv, maxval=stdv)

    ws, us, bs = [], [], []
    for _gate in ["i", "f", "c", "o"]:
        ws.append(unif(next(ki), (input_size, hidden_size), input_size))
        us.append(unif(next(ki), (hidden_size, hidden_size), hidden_size))
        bs.append(unif(next(ki), (hidden_size,), hidden_size))
    z_c = unif(next(ki), (hidden_size, hidden_size), hidden_size)

    return {
        "W": jnp.concatenate(ws, axis=1),            # [E, 4H]
        "U": jnp.concatenate(us, axis=1),            # [H, 4H]
        "b": jnp.concatenate(bs, axis=0)[None, :],   # [1, 4H]
        "z_c": z_c,                                  # [H, H]
    }


def to_bf16_weights(params):
    """bf16 weights, f32 bias; kernels keep f32 accumulation / gate math."""
    out = dict(params)
    for k in ("W", "U", "z_c"):
        out[k] = params[k].astype(jnp.bfloat16)
    return out


# ----------------------------------------------------------------------------
# Pure-JAX references (mirror the PyTorch forward)
# ----------------------------------------------------------------------------

def reference_step(embedded, states, attended, base, hidden_size):
    h, c = states
    H = hidden_size
    W = base["W"].astype(jnp.float32)
    U = base["U"].astype(jnp.float32)
    zc = base["z_c"].astype(jnp.float32)
    pre = embedded @ W + h @ U + base["b"]
    i = jax.nn.sigmoid(pre[:, 0 * H:1 * H])
    f = jax.nn.sigmoid(pre[:, 1 * H:2 * H])
    c_hat = jnp.tanh(pre[:, 2 * H:3 * H] + attended @ zc)
    o = jax.nn.sigmoid(pre[:, 3 * H:4 * H])
    c_new = f * c + i * c_hat
    h_new = o * jnp.tanh(c_new)
    return h_new, c_new


def reference_sequence(embedded_seq, states, attended_seq, base, hidden_size):
    h, c = states
    hs = []
    for t in range(embedded_seq.shape[0]):
        h, c = reference_step(embedded_seq[t], (h, c), attended_seq[t], base,
                              hidden_size)
        hs.append(h)
    return jnp.stack(hs, axis=0), (h, c)


# ----------------------------------------------------------------------------
# Test
# ----------------------------------------------------------------------------

if __name__ == "__main__":
    batch = 8
    input_size = 64
    hidden_size = 128
    seq_len = 8

    key = jax.random.PRNGKey(0)
    k_param, k_emb, k_h, k_c, k_att = jax.random.split(key, 5)

    params = init_params(k_param, input_size, hidden_size)

    embedded_seq = jax.random.normal(k_emb, (seq_len, batch, input_size),
                                     jnp.float32)
    attended_seq = jax.random.normal(k_att, (seq_len, batch, hidden_size),
                                     jnp.float32)
    h0 = jax.random.normal(k_h, (batch, hidden_size), jnp.float32)
    c0 = jax.random.normal(k_c, (batch, hidden_size), jnp.float32)

    # --- single step ---------------------------------------------------------
    h1, c1 = att2in_lstm_cell(embedded_seq[0], (h0, c0), attended_seq[0], params)
    jax.block_until_ready((h1, c1))
    h1_ref, c1_ref = reference_step(embedded_seq[0], (h0, c0), attended_seq[0],
                                    params, hidden_size)
    assert jnp.allclose(h1, h1_ref, atol=1e-4, rtol=1e-4)
    assert jnp.allclose(c1, c1_ref, atol=1e-4, rtol=1e-4)

    # --- full sequence, single chunk (weights resident, projection hoisted) --
    h_seq_ref, (h_T_ref, c_T_ref) = reference_sequence(
        embedded_seq, (h0, c0), attended_seq, params, hidden_size)

    h_seq, (h_T, c_T) = att2in_lstm_sequence(embedded_seq, (h0, c0),
                                             attended_seq, params, chunk=8)
    jax.block_until_ready((h_seq, h_T, c_T))
    assert jnp.allclose(h_seq, h_seq_ref, atol=2e-4, rtol=2e-4)
    assert jnp.allclose(h_T, h_T_ref, atol=2e-4, rtol=2e-4)
    assert jnp.allclose(c_T, c_T_ref, atol=2e-4, rtol=2e-4)

    # --- full sequence, multiple chunks (state carried across grid steps) ----
    h_seq2, (h_T2, c_T2) = att2in_lstm_sequence(embedded_seq, (h0, c0),
                                                attended_seq, params, chunk=4)
    jax.block_until_ready((h_seq2, h_T2, c_T2))
    assert jnp.allclose(h_seq2, h_seq_ref, atol=2e-4, rtol=2e-4)
    assert jnp.allclose(h_T2, h_T_ref, atol=2e-4, rtol=2e-4)
    assert jnp.allclose(c_T2, c_T_ref, atol=2e-4, rtol=2e-4)

    # --- bf16 weights (halve HBM weight traffic / VMEM residency) ------------
    params_bf16 = to_bf16_weights(params)
    h_seq_b, (h_T_b, c_T_b) = att2in_lstm_sequence(embedded_seq, (h0, c0),
                                                   attended_seq, params_bf16,
                                                   chunk=8)
    jax.block_until_ready((h_seq_b, h_T_b, c_T_b))
    assert jnp.allclose(h_seq_b, h_seq_ref, atol=5e-2, rtol=5e-2)
    assert jnp.allclose(c_T_b, c_T_ref, atol=5e-2, rtol=5e-2)

    print("KERNEL_OK")
</pallas_src>

<mosaic_0001>
module attributes {stable_mosaic.version = 11 : i64} {
  func.func @_att2in_cell_kernel(%arg0: memref<8x64xf32, #tpu.memory_space<vmem>>, %arg1: memref<8x128xf32, #tpu.memory_space<vmem>>, %arg2: memref<8x128xf32, #tpu.memory_space<vmem>>, %arg3: memref<8x128xf32, #tpu.memory_space<vmem>>, %arg4: memref<64x512xf32, #tpu.memory_space<vmem>>, %arg5: memref<128x512xf32, #tpu.memory_space<vmem>>, %arg6: memref<128x128xf32, #tpu.memory_space<vmem>>, %arg7: memref<1x512xf32, #tpu.memory_space<vmem>>, %arg8: memref<8x128xf32, #tpu.memory_space<vmem>>, %arg9: memref<8x128xf32, #tpu.memory_space<vmem>>) attributes {dimension_semantics = [], scalar_prefetch = 0 : i64, scratch_operands = 0 : i64, tpu.core_type = #tpu.core_type<tc>} {
    %c0 = arith.constant 0 : index
    %c0_0 = arith.constant 0 : index
    %0 = vector.load %arg0[%c0, %c0_0] : memref<8x64xf32, #tpu.memory_space<vmem>>, vector<8x64xf32>
    %c0_1 = arith.constant 0 : index
    %c0_2 = arith.constant 0 : index
    %1 = vector.load %arg4[%c0_1, %c0_2] : memref<64x512xf32, #tpu.memory_space<vmem>>, vector<64x512xf32>
    %cst = arith.constant dense<0.000000e+00> : vector<8x512xf32>
    %2 = tpu.matmul %0, %1, %cst {dimension_numbers = #tpu.dot_dimension_numbers<[1], [0], [0], [1], [0, 0, 1, 1], [], []>} : vector<8x64xf32>, vector<64x512xf32>, vector<8x512xf32> -> vector<8x512xf32>
    %c0_3 = arith.constant 0 : index
    %c0_4 = arith.constant 0 : index
    %3 = vector.load %arg1[%c0_3, %c0_4] : memref<8x128xf32, #tpu.memory_space<vmem>>, vector<8x128xf32>
    %c0_5 = arith.constant 0 : index
    %c0_6 = arith.constant 0 : index
    %4 = vector.load %arg5[%c0_5, %c0_6] : memref<128x512xf32, #tpu.memory_space<vmem>>, vector<128x512xf32>
    %cst_7 = arith.constant dense<0.000000e+00> : vector<8x512xf32>
    %5 = tpu.matmul %3, %4, %cst_7 {dimension_numbers = #tpu.dot_dimension_numbers<[1], [0], [0], [1], [0, 0, 1, 1], [], []>} : vector<8x128xf32>, vector<128x512xf32>, vector<8x512xf32> -> vector<8x512xf32>
    %6 = arith.addf %2, %5 : vector<8x512xf32>
    %c0_8 = arith.constant 0 : index
    %c0_9 = arith.constant 0 : index
    %7 = vector.load %arg7[%c0_8, %c0_9] : memref<1x512xf32, #tpu.memory_space<vmem>>, vector<1x512xf32>
    %8 = vector.broadcast %7 : vector<1x512xf32> to vector<8x512xf32>
    %9 = arith.addf %6, %8 : vector<8x512xf32>
    %c0_10 = arith.constant 0 : index
    %c0_11 = arith.constant 0 : index
    %10 = vector.load %arg3[%c0_10, %c0_11] : memref<8x128xf32, #tpu.memory_space<vmem>>, vector<8x128xf32>
    %c0_12 = arith.constant 0 : index
    %c0_13 = arith.constant 0 : index
    %11 = vector.load %arg6[%c0_12, %c0_13] : memref<128x128xf32, #tpu.memory_space<vmem>>, vector<128x128xf32>
    %cst_14 = arith.constant dense<0.000000e+00> : vector<8x128xf32>
    %12 = tpu.matmul %10, %11, %cst_14 {dimension_numbers = #tpu.dot_dimension_numbers<[1], [0], [0], [1], [0, 0, 1, 1], [], []>} : vector<8x128xf32>, vector<128x128xf32>, vector<8x128xf32> -> vector<8x128xf32>
    %13 = vector.extract_strided_slice %9 {offsets = [0, 0], sizes = [8, 128], strides = [1, 1]} : vector<8x512xf32> to vector<8x128xf32>
    %14 = arith.negf %13 : vector<8x128xf32>
    %15 = math.exp %14 : vector<8x128xf32>
    %cst_15 = arith.constant 1.000000e+00 : f32
    %16 = vector.broadcast %cst_15 : f32 to vector<8x128xf32>
    %17 = arith.addf %16, %15 : vector<8x128xf32>
    %18 = arith.divf %16, %17 : vector<8x128xf32>
    %19 = vector.extract_strided_slice %9 {offsets = [0, 128], sizes = [8, 128], strides = [1, 1]} : vector<8x512xf32> to vector<8x128xf32>
    %20 = arith.negf %19 : vector<8x128xf32>
    %21 = math.exp %20 : vector<8x128xf32>
    %cst_16 = arith.constant 1.000000e+00 : f32
    %22 = vector.broadcast %cst_16 : f32 to vector<8x128xf32>
    %23 = arith.addf %22, %21 : vector<8x128xf32>
    %24 = arith.divf %22, %23 : vector<8x128xf32>
    %25 = vector.extract_strided_slice %9 {offsets = [0, 256], sizes = [8, 128], strides = [1, 1]} : vector<8x512xf32> to vector<8x128xf32>
    %26 = arith.addf %25, %12 : vector<8x128xf32>
    %27 = math.tanh %26 : vector<8x128xf32>
    %28 = vector.extract_strided_slice %9 {offsets = [0, 384], sizes = [8, 128], strides = [1, 1]} : vector<8x512xf32> to vector<8x128xf32>
    %29 = arith.negf %28 : vector<8x128xf32>
    %30 = math.exp %29 : vector<8x128xf32>
    %cst_17 = arith.constant 1.000000e+00 : f32
    %31 = vector.broadcast %cst_17 : f32 to vector<8x128xf32>
    %32 = arith.addf %31, %30 : vector<8x128xf32>
    %33 = arith.divf %31, %32 : vector<8x128xf32>
    %c0_18 = arith.constant 0 : index
    %c0_19 = arith.constant 0 : index
    %34 = vector.load %arg2[%c0_18, %c0_19] : memref<8x128xf32, #tpu.memory_space<vmem>>, vector<8x128xf32>
    %35 = arith.mulf %24, %34 : vector<8x128xf32>
    %36 = arith.mulf %18, %27 : vector<8x128xf32>
    %37 = arith.addf %35, %36 : vector<8x128xf32>
    %38 = math.tanh %37 : vector<8x128xf32>
    %39 = arith.mulf %33, %38 : vector<8x128xf32>
    %c0_20 = arith.constant 0 : index
    %c0_21 = arith.constant 0 : index
    %40 = vector.load %arg8[%c0_20, %c0_21] : memref<8x128xf32, #tpu.memory_space<vmem>>, vector<8x128xf32>
    tpu.vector_store %arg8[%c0_20, %c0_21], %39 {strides = array<i32>} : memref<8x128xf32, #tpu.memory_space<vmem>>, vector<8x128xf32>,
    %c0_22 = arith.constant 0 : index
    %c0_23 = arith.constant 0 : index
    %41 = vector.load %arg9[%c0_22, %c0_23] : memref<8x128xf32, #tpu.memory_space<vmem>>, vector<8x128xf32>
    tpu.vector_store %arg9[%c0_22, %c0_23], %37 {strides = array<i32>} : memref<8x128xf32, #tpu.memory_space<vmem>>, vector<8x128xf32>,
    return
  }
}

</mosaic_0001>

<bundles_post_ra>
// kernel: tpu_custom_call.1
= control target key start
LH: loop header
LB: loop body
LE: loop exit
PB: predicated region body
PF: predicated region fallthrough
CT: control target
= control target key end

     0   :  { %15 = vsyncpa [#allocation3], 0  ;;  %s1087_s0 = inlined_call_operand.hbm [shape: f32[8,64], index: 0, kind: input, shape index: {}]   ;;  %s1088_s1 = inlined_call_operand.hbm [shape: f32[8,128], index: 1, kind: input, shape index: {}]   ;;  %s1089_s2 = inlined_call_operand.hbm [shape: f32[8,128], index: 2, kind: input, shape index: {}]   ;;  %s1090_s3 = inlined_call_operand.hbm [shape: f32[8,128], index: 3, kind: input, shape index: {}]   ;;  %s1091_s4 = inlined_call_operand.hbm [shape: f32[64,512], index: 4, kind: input, shape index: {}]   ;;  %s1092_s5 = inlined_call_operand.hbm [shape: f32[128,512], index: 5, kind: input, shape index: {}]   ;;  %s1093_s6 = inlined_call_operand.hbm [shape: f32[128,128], index: 6, kind: input, shape index: {}]   ;;  %s1094_s7 = inlined_call_operand.vmem [shape: f32[1,512], index: 7, kind: input, shape index: {}]   ;;  %s1095_s8 = inlined_call_operand.hbm [shape: f32[8,128], index: 8, kind: output, shape index: {0}]   ;;  %s1096_s9 = inlined_call_operand.hbm [shape: f32[8,128], index: 9, kind: output, shape index: {1}]  }
   0x1   :  { %16 = vsyncpa [#allocation6], 0 }
   0x2   :  { %17 = vsyncpa [#allocation9], 0 }
   0x3   :  { %18 = vsyncpa [#allocation12], 0 }
   0x4   :  { %19 = vsyncpa [#allocation4], 0 }
   0x5   :  { %20 = vsyncpa [#allocation16], 0  ;;  %s959_s30 = smov [#allocation5]   ;;  %s960_s11 = smov [#allocation8]  }
   0x6   :  { %s37_s10 = sshll.u32 %s959_s30, 4  ;;  %s57_s12 = sshll.u32 %s960_s11, 4  ;;  %s38_s10 = int_to_ptr.vmem [resolvable:$true] %s37_s10  ;;  %s58_s12 = int_to_ptr.vmem [resolvable:$true] %s57_s12 }
   0x7   :  { %s775_s13 = scalar_lea.vmem %s38_s10, 128  ;;  %p780_p1 = scmp.lt.s32.totalorder %s38_s10, %s38_s10 }
   0x8   :  { %p776_p0 = scmp.ne.s32.totalorder %s38_s10, %s775_s13  ;;  %p781_p2 = scmp.lt.s32.totalorder %s775_s13, %s775_s13 }
   0xa   :  { %p782_p3 = por %p781_p2, %p780_p1 }
   0xc   :  { %p783_p4 = pnand %p782_p3, %p776_p0 }
   0xe   :  { %786 = shalt.err (!%p783_p4)
}
   0xf   :  { %40 = dma.hbm_to_vmem [thread:$0]  %s1088_s1, 128, %s38_s10, [#allocation6]  }
  0x10   :  { %s795_s16 = scalar_lea.vmem %s58_s12, 128  ;;  %p800_p6 = scmp.lt.s32.totalorder %s58_s12, %s58_s12 }
  0x11   :  { %p796_p5 = scmp.ne.s32.totalorder %s58_s12, %s795_s16  ;;  %p801_p7 = scmp.lt.s32.totalorder %s795_s16, %s795_s16 }
  0x13   :  { %p802_p8 = por %p801_p7, %p800_p6 }
  0x15   :  { %p803_p9 = pnand %p802_p8, %p796_p5 }
  0x17   :  { %806 = shalt.err (!%p803_p9)
}
  0x18   :  { %60 = dma.hbm_to_vmem [thread:$0]  %s1090_s3, 128, %s58_s12, [#allocation9]  }
  0x19   :  { %s961_s19 = smov [#allocation11]   ;;  %s962_s21 = smov [#allocation2]  }
  0x1a   :  { %s78_s20 = sshll.u32 %s961_s19, 4  ;;  %s27_s22 = sshll.u32 %s962_s21, 4  ;;  %s79_s20 = int_to_ptr.vmem [resolvable:$true] %s78_s20  ;;  %s28_s22 = int_to_ptr.vmem [resolvable:$true] %s27_s22 }
  0x1b   :  { %s815_s23 = scalar_lea.vmem %s79_s20, 8192  ;;  %p820_p11 = scmp.lt.s32.totalorder %s79_s20, %s79_s20 }
  0x1c   :  { %p816_p10 = scmp.ne.s32.totalorder %s79_s20, %s815_s23  ;;  %p821_p12 = scmp.lt.s32.totalorder %s815_s23, %s815_s23 }
  0x1e   :  { %p822_p13 = por %p821_p12, %p820_p11 }
  0x20   :  { %p823_p0 = pnand %p822_p13, %p816_p10 }
  0x22   :  { %826 = shalt.err (!%p823_p0)
}
  0x23   :  { %s963_s1 = smov 512   ;;  %s964_s24 = smov 32  }
  0x24   :  { %84 = dma.hbm_to_vmem [thread:$0]  %s1092_s5, 8192, %s79_s20, [#allocation12], %s963_s1, %s963_s1, %s964_s24  }
  0x25   :  { %s835_s26 = scalar_lea.vmem %s28_s22, 128  ;;  %p840_p2 = scmp.lt.s32.totalorder %s28_s22, %s28_s22 }
  0x26   :  { %p836_p1 = scmp.ne.s32.totalorder %s28_s22, %s835_s26  ;;  %p841_p3 = scmp.lt.s32.totalorder %s835_s26, %s835_s26 }
  0x28   :  { %p842_p4 = por %p841_p3, %p840_p2 }
  0x2a   :  { %p843_p5 = pnand %p842_p4, %p836_p1 }
  0x2c   :  { %846 = shalt.err (!%p843_p5)
}
  0x2d   :  { %30 = dma.hbm_to_vmem [thread:$0]  %s1087_s0, 128, %s28_s22, [#allocation3]  }
  0x2e   :  { %s965_s29 = smov [#allocation7]   ;;  %s966_s10 = smov [#allocation10]  }
  0x2f   :  { %s47_s30 = sshll.u32 %s965_s29, 4  ;;  %s66_s11 = sshll.u32 %s966_s10, 4  ;;  %s48_s30 = int_to_ptr.vmem [resolvable:$true] %s47_s30  ;;  %s67_s11 = int_to_ptr.vmem [resolvable:$true] %s66_s11 }
  0x30   :  { %s855_s12 = scalar_lea.vmem %s48_s30, 128  ;;  %p860_p7 = scmp.lt.s32.totalorder %s48_s30, %s48_s30 }
  0x31   :  { %p856_p6 = scmp.ne.s32.totalorder %s48_s30, %s855_s12  ;;  %p861_p8 = scmp.lt.s32.totalorder %s855_s12, %s855_s12 }
  0x33   :  { %p862_p9 = por %p861_p8, %p860_p7 }
  0x35   :  { %p863_p10 = pnand %p862_p9, %p856_p6 }
  0x37   :  { %866 = shalt.err (!%p863_p10)
}
  0x38   :  { %50 = dma.hbm_to_vmem [thread:$0]  %s1089_s2, 128, %s48_s30, [#allocation6]  }
  0x39   :  { %s875_s14 = scalar_lea.vmem %s67_s11, 4096  ;;  %p880_p12 = scmp.lt.s32.totalorder %s67_s11, %s67_s11 }
  0x3a   :  { %p876_p11 = scmp.ne.s32.totalorder %s67_s11, %s875_s14  ;;  %p881_p13 = scmp.lt.s32.totalorder %s875_s14, %s875_s14 }
  0x3c   :  { %p882_p0 = por %p881_p13, %p880_p12 }
  0x3e   :  { %p883_p1 = pnand %p882_p0, %p876_p11 }
  0x40   :  { %886 = shalt.err (!%p883_p1)
}
  0x41   :  { %72 = dma.hbm_to_vmem [thread:$0]  %s1091_s4, 4096, %s67_s11, [#allocation9], %s963_s1, %s963_s1, %s964_s24  }
  0x42   :  { %s967_s16 = smov [#allocation13]  }
  0x43   :  { %s90_s17 = sshll.u32 %s967_s16, 4  ;;  %s91_s17 = int_to_ptr.vmem [resolvable:$true] %s90_s17 }
  0x44   :  { %s895_s18 = scalar_lea.vmem %s91_s17, 2048  ;;  %p900_p3 = scmp.lt.s32.totalorder %s91_s17, %s91_s17 }
  0x45   :  { %p896_p2 = scmp.ne.s32.totalorder %s91_s17, %s895_s18  ;;  %p901_p4 = scmp.lt.s32.totalorder %s895_s18, %s895_s18 }
  0x47   :  { %p902_p5 = por %p901_p4, %p900_p3 }
  0x49   :  { %p903_p6 = pnand %p902_p5, %p896_p2 }
  0x4b   :  { %906 = shalt.err (!%p903_p6)
}
  0x4c   :  { %s968_s2 = smov 128   ;;  %s969_s19 = smov 8  }
  0x4d   :  { %96 = dma.hbm_to_vmem [thread:$0]  %s1093_s6, 2048, %s91_s17, [#allocation12], %s968_s2, %s968_s2, %s969_s19  }
  0x4e   :  { %947 = dma.done.wait [#allocation3], 128  }
  0x4f   :  { %948 = vsyncadd [#allocation3], 4294967168 }
  0x50   :  { %949 = dma.done.wait [#allocation6], 256  }
  0x51   :  { %950 = vsyncadd [#allocation6], 4294967040 }
  0x52   :  { %951 = dma.done.wait [#allocation9], 4224  }
  0x53   :  { %952 = vsyncadd [#allocation9], 4294963072 }
  0x54   :  { %953 = dma.done.wait [#allocation12], 10240  }
  0x55   :  { %954 = vsyncadd [#allocation12], 4294957056  ;;  %v970_v0 = vmov 0.0   ;;  %v217_v1 = vld [vmem:[#allocation11 + $0x1f8] sm:$0xff]  ;;  %v216_v2 = vld [vmem:[#allocation11 + $0x1f0] sm:$0xff]  ;;  %vm360_vm0 = vcmask 523264  }
  0x56   :  { %353 = vmatprep.mubr.f32.mxu1 %v970_v0  ;;  %282 = vmatprep.mubr.f32.mxu0 %v970_v0  ;;  %v213_v3 = vld [vmem:[#allocation11 + $0x1d8] sm:$0xff]  ;;  %v212_v4 = vld [vmem:[#allocation11 + $0x1d0] sm:$0xff]  ;;  %v215_v5 = vld [vmem:[#allocation11 + $0x1e8] sm:$0xff]  ;;  %vm971_vm1 = vmmov 0  }
  0x57   :  { %289 = vmatprep.subr.mxu1 %v217_v1  ;;  %218 = vmatprep.subr.mxu0 %v215_v5  ;;  %v209_v6 = vld [vmem:[#allocation11 + $0x1b8] sm:$0xff]  ;;  %v214_v7 = vld [vmem:[#allocation11 + $0x1e0] sm:$0xff]  ;;  %v211_v8 = vld [vmem:[#allocation11 + $0x1c8] sm:$0xff] }
  0x58   :  { %290 = vmatpush1.msra.mxu1 %v216_v2  ;;  %219 = vmatpush1.msra.mxu0 %v214_v7  ;;  %v208_v9 = vld [vmem:[#allocation11 + $0x1b0] sm:$0xff]  ;;  %v210_v10 = vld [vmem:[#allocation11 + $0x1c0] sm:$0xff]  ;;  %v205_v11 = vld [vmem:[#allocation11 + $0x198] sm:$0xff] }
  0x59   :  { %291 = vmatprep.subr.mxu1 %v213_v3  ;;  %220 = vmatprep.subr.mxu0 %v211_v8  ;;  %v207_v12 = vld [vmem:[#allocation11 + $0x1a8] sm:$0xff]  ;;  %v206_v13 = vld [vmem:[#allocation11 + $0x1a0] sm:$0xff]  ;;  %v204_v14 = vld [vmem:[#allocation11 + $0x190] sm:$0xff] }
  0x5a   :  { %292 = vmatpush1.msra.mxu1 %v212_v4  ;;  %221 = vmatpush1.msra.mxu0 %v210_v10  ;;  %v203_v15 = vld [vmem:[#allocation11 + $0x188] sm:$0xff]  ;;  %v201_v16 = vld [vmem:[#allocation11 + $0x178] sm:$0xff]  ;;  %v202_v17 = vld [vmem:[#allocation11 + $0x180] sm:$0xff] }
  0x5b   :  { %293 = vmatprep.subr.mxu1 %v209_v6  ;;  %222 = vmatprep.subr.mxu0 %v207_v12  ;;  %v200_v18 = vld [vmem:[#allocation11 + $0x170] sm:$0xff]  ;;  %v199_v19 = vld [vmem:[#allocation11 + $0x168] sm:$0xff]  ;;  %v197_v20 = vld [vmem:[#allocation11 + $0x158] sm:$0xff] }
  0x5c   :  { %294 = vmatpush1.msra.mxu1 %v208_v9  ;;  %223 = vmatpush1.msra.mxu0 %v206_v13  ;;  %v198_v21 = vld [vmem:[#allocation11 + $0x160] sm:$0xff]  ;;  %v196_v22 = vld [vmem:[#allocation11 + $0x150] sm:$0xff]  ;;  %v195_v23 = vld [vmem:[#allocation11 + $0x148] sm:$0xff] }
  0x5d   :  { %295 = vmatprep.subr.mxu1 %v205_v11  ;;  %224 = vmatprep.subr.mxu0 %v203_v15  ;;  %v193_v24 = vld [vmem:[#allocation11 + $0x138] sm:$0xff]  ;;  %v194_v25 = vld [vmem:[#allocation11 + $0x140] sm:$0xff]  ;;  %v192_v26 = vld [vmem:[#allocation11 + $0x130] sm:$0xff] }
  0x5e   :  { %296 = vmatpush1.msra.mxu1 %v204_v14  ;;  %225 = vmatpush1.msra.mxu0 %v202_v17  ;;  %v191_v27 = vld [vmem:[#allocation11 + $0x128] sm:$0xff]  ;;  %v189_v28 = vld [vmem:[#allocation11 + $0x118] sm:$0xff]  ;;  %v190_v29 = vld [vmem:[#allocation11 + $0x120] sm:$0xff] }
  0x5f   :  { %297 = vmatprep.subr.mxu1 %v201_v16  ;;  %226 = vmatprep.subr.mxu0 %v199_v19  ;;  %v188_v30 = vld [vmem:[#allocation11 + $0x110] sm:$0xff]  ;;  %v187_v31 = vld [vmem:[#allocation11 + $0x108] sm:$0xff]  ;;  %v185_v32 = vld [vmem:[#allocation11 + $0xf8] sm:$0xff] }
  0x60   :  { %298 = vmatpush1.msra.mxu1 %v200_v18  ;;  %227 = vmatpush1.msra.mxu0 %v198_v21  ;;  %v186_v33 = vld [vmem:[#allocation11 + $0x100] sm:$0xff]  ;;  %v184_v34 = vld [vmem:[#allocation11 + $0xf0] sm:$0xff]  ;;  %v183_v35 = vld [vmem:[#allocation11 + $0xe8] sm:$0xff] }
  0x61   :  { %299 = vmatprep.subr.mxu1 %v197_v20  ;;  %228 = vmatprep.subr.mxu0 %v195_v23  ;;  %v181_v36 = vld [vmem:[#allocation11 + $0xd8] sm:$0xff]  ;;  %v182_v37 = vld [vmem:[#allocation11 + $0xe0] sm:$0xff]  ;;  %v180_v38 = vld [vmem:[#allocation11 + $0xd0] sm:$0xff] }
  0x62   :  { %300 = vmatpush1.msra.mxu1 %v196_v22  ;;  %229 = vmatpush1.msra.mxu0 %v194_v25  ;;  %v179_v39 = vld [vmem:[#allocation11 + $0xc8] sm:$0xff]  ;;  %v177_v40 = vld [vmem:[#allocation11 + $0xb8] sm:$0xff]  ;;  %v178_v41 = vld [vmem:[#allocation11 + $0xc0] sm:$0xff] }
  0x63   :  { %301 = vmatprep.subr.mxu1 %v193_v24  ;;  %230 = vmatprep.subr.mxu0 %v191_v27  ;;  %v176_v42 = vld [vmem:[#allocation11 + $0xb0] sm:$0xff]  ;;  %v175_v43 = vld [vmem:[#allocation11 + $0xa8] sm:$0xff]  ;;  %v173_v44 = vld [vmem:[#allocation11 + $0x98] sm:$0xff] }
  0x64   :  { %302 = vmatpush1.msra.mxu1 %v192_v26  ;;  %231 = vmatpush1.msra.mxu0 %v190_v29  ;;  %v174_v45 = vld [vmem:[#allocation11 + $0xa0] sm:$0xff]  ;;  %v172_v46 = vld [vmem:[#allocation11 + $0x90] sm:$0xff]  ;;  %v171_v47 = vld [vmem:[#allocation11 + $0x88] sm:$0xff] }
  0x65   :  { %303 = vmatprep.subr.mxu1 %v189_v28  ;;  %232 = vmatprep.subr.mxu0 %v187_v31  ;;  %v169_v48 = vld [vmem:[#allocation11 + $0x78] sm:$0xff]  ;;  %v170_v49 = vld [vmem:[#allocation11 + $0x80] sm:$0xff]  ;;  %v168_v50 = vld [vmem:[#allocation11 + $0x70] sm:$0xff] }
  0x66   :  { %304 = vmatpush1.msra.mxu1 %v188_v30  ;;  %233 = vmatpush1.msra.mxu0 %v186_v33  ;;  %v167_v51 = vld [vmem:[#allocation11 + $0x68] sm:$0xff]  ;;  %v165_v52 = vld [vmem:[#allocation11 + $0x58] sm:$0xff]  ;;  %v166_v53 = vld [vmem:[#allocation11 + $0x60] sm:$0xff] }
  0x67   :  { %305 = vmatprep.subr.mxu1 %v185_v32  ;;  %234 = vmatprep.subr.mxu0 %v183_v35  ;;  %v164_v54 = vld [vmem:[#allocation11 + $0x50] sm:$0xff]  ;;  %v163_v55 = vld [vmem:[#allocation11 + $0x48] sm:$0xff]  ;;  %v161_v56 = vld [vmem:[#allocation11 + $0x38] sm:$0xff] }
  0x68   :  { %306 = vmatpush1.msra.mxu1 %v184_v34  ;;  %235 = vmatpush1.msra.mxu0 %v182_v37  ;;  %v162_v57 = vld [vmem:[#allocation11 + $0x40] sm:$0xff]  ;;  %v160_v58 = vld [vmem:[#allocation11 + $0x30] sm:$0xff]  ;;  %v159_v59 = vld [vmem:[#allocation11 + $0x28] sm:$0xff] }
  0x69   :  { %307 = vmatprep.subr.mxu1 %v181_v36  ;;  %236 = vmatprep.subr.mxu0 %v179_v39  ;;  %v157_v60 = vld [vmem:[#allocation11 + $0x18] sm:$0xff]  ;;  %v158_v61 = vld [vmem:[#allocation11 + $0x20] sm:$0xff]  ;;  %v156_v62 = vld [vmem:[#allocation11 + $0x10] sm:$0xff] }
  0x6a   :  { %308 = vmatpush1.msra.mxu1 %v180_v38  ;;  %237 = vmatpush1.msra.mxu0 %v178_v41  ;;  %v155_v63 = vld [vmem:[#allocation11 + $0x8] sm:$0xff]  ;;  %v149_v3 = vld [vmem:[#allocation10 + $0xe0] sm:$0xff]  ;;  %v548_v8 = vld [vmem:[#allocation13 + $0x78] sm:$0xff] }
  0x6b   :  { %309 = vmatprep.subr.mxu1 %v177_v40  ;;  %238 = vmatprep.subr.mxu0 %v175_v43  ;;  %v153_v1 = vld [vmem:[#allocation5] sm:$0xff]  ;;  %v154_v4 = vld [vmem:[#allocation11] sm:$0xff]  ;;  %v547_v11 = vld [vmem:[#allocation13 + $0x70] sm:$0xff] }
  0x6c   :  { %310 = vmatpush1.msra.mxu1 %v176_v42  ;;  %239 = vmatpush1.msra.mxu0 %v174_v45  ;;  %v150_v2 = vld [vmem:[#allocation10 + $0xe8] sm:$0xff]  ;;  %v145_v6 = vld [vmem:[#allocation10 + $0xc0] sm:$0xff]  ;;  %v544_v20 = vld [vmem:[#allocation13 + $0x58] sm:$0xff] }
  0x6d   :  { %311 = vmatprep.subr.mxu1 %v173_v44  ;;  %240 = vmatprep.subr.mxu0 %v171_v47  ;;  %v146_v5 = vld [vmem:[#allocation10 + $0xc8] sm:$0xff]  ;;  %v141_v9 = vld [vmem:[#allocation10 + $0xa0] sm:$0xff]  ;;  %v543_v24 = vld [vmem:[#allocation13 + $0x50] sm:$0xff] }
  0x6e   :  { %312 = vmatpush1.msra.mxu1 %v172_v46  ;;  %241 = vmatpush1.msra.mxu0 %v170_v49  ;;  %v142_v7 = vld [vmem:[#allocation10 + $0xa8] sm:$0xff]  ;;  %v137_v12 = vld [vmem:[#allocation10 + $0x80] sm:$0xff]  ;;  %v152_v26 = vld [vmem:[#allocation10 + $0xf8] sm:$0xff] }
  0x6f   :  { %313 = vmatprep.subr.mxu1 %v169_v48  ;;  %242 = vmatprep.subr.mxu0 %v167_v51  ;;  %v138_v10 = vld [vmem:[#allocation10 + $0x88] sm:$0xff]  ;;  %v133_v15 = vld [vmem:[#allocation10 + $0x60] sm:$0xff]  ;;  %v151_v27 = vld [vmem:[#allocation10 + $0xf0] sm:$0xff] }
  0x70   :  { %314 = vmatpush1.msra.mxu1 %v168_v50  ;;  %243 = vmatpush1.msra.mxu0 %v166_v53  ;;  %v134_v13 = vld [vmem:[#allocation10 + $0x68] sm:$0xff]  ;;  %v545_v17 = vld [vmem:[#allocation13 + $0x60] sm:$0xff]  ;;  %v148_v29 = vld [vmem:[#allocation10 + $0xd8] sm:$0xff]  ;;  %v508_v53 = vlaneseq }
  0x71   :  { %315 = vmatprep.subr.mxu1 %v165_v52  ;;  %244 = vmatprep.subr.mxu0 %v163_v55  ;;  %v546_v14 = vld [vmem:[#allocation13 + $0x68] sm:$0xff]  ;;  %v129_v18 = vld [vmem:[#allocation10 + $0x40] sm:$0xff]  ;;  %v147_v30 = vld [vmem:[#allocation10 + $0xd0] sm:$0xff] }
  0x72   :  { %316 = vmatpush1.msra.mxu1 %v164_v54  ;;  %245 = vmatpush1.msra.mxu0 %v162_v57  ;;  %v130_v16 = vld [vmem:[#allocation10 + $0x48] sm:$0xff]  ;;  %v125_v21 = vld [vmem:[#allocation10 + $0x20] sm:$0xff]  ;;  %v144_v32 = vld [vmem:[#allocation10 + $0xb8] sm:$0xff]  ;;  %v509_v54 = vshrl.u32 %v508_v53, 7 }
  0x73   :  { %317 = vmatprep.subr.mxu1 %v161_v56  ;;  %246 = vmatprep.subr.mxu0 %v159_v59  ;;  %v126_v19 = vld [vmem:[#allocation10 + $0x28] sm:$0xff]  ;;  %v121_v23 = vld [vmem:[#allocation10] sm:$0xff]  ;;  %v143_v33 = vld [vmem:[#allocation10 + $0xb0] sm:$0xff] }
  0x74   :  { %318 = vmatpush1.msra.mxu1 %v160_v58  ;;  %247 = vmatpush1.msra.mxu0 %v158_v61  ;;  %v122_v22 = vld [vmem:[#allocation10 + $0x8] sm:$0xff]  ;;  %v1059_v25 = vld [vmem:[#allocation2] sm:$0xff]  ;;  %v540_v34 = vld [vmem:[#allocation13 + $0x38] sm:$0xff]  ;;  %v510_v56 = vsub.s32 0, %v509_v54  ;;  %v514_v58 = vsub.s32 1, %v509_v54 }
  0x75   :  { %319 = vmatprep.subr.mxu1 %v157_v60  ;;  %248 = vmatprep.subr.mxu0 %v155_v63  ;;  %v542_v28 = vld [vmem:[#allocation13 + $0x48] sm:$0xff]  ;;  %v541_v31 = vld [vmem:[#allocation13 + $0x40] sm:$0xff]  ;;  %v140_v35 = vld [vmem:[#allocation10 + $0x98] sm:$0xff] }
  0x76   :  { %320 = vmatpush1.msra.mxu1 %v156_v62  ;;  %249 = vmatpush1.msra.mxu0 %v154_v4  ;;  %v139_v36 = vld [vmem:[#allocation10 + $0x90] sm:$0xff]  ;;  %v136_v38 = vld [vmem:[#allocation10 + $0x78] sm:$0xff]  ;;  %v538_v40 = vld [vmem:[#allocation13 + $0x28] sm:$0xff] }
  0x77   :  { %354 = vmatmul.mubr.f32.vlgmr.msra.gmra.mxu1 %v153_v1  ;;  %380 = vmatprep.subr.mxu1 %v150_v2  ;;  %v539_v37 = vld [vmem:[#allocation13 + $0x30] sm:$0xff]  ;;  %v132_v41 = vld [vmem:[#allocation10 + $0x58] sm:$0xff]  ;;  %v537_v43 = vld [vmem:[#allocation13 + $0x20] sm:$0xff] }
  0x78   :  { %381 = vmatpush1.msra.mxu1 %v149_v3  ;;  %701 = vmatprep.subr.mxu0 %v970_v0  ;;  %v135_v39 = vld [vmem:[#allocation10 + $0x70] sm:$0xff]  ;;  %v128_v44 = vld [vmem:[#allocation10 + $0x38] sm:$0xff]  ;;  %v534_v50 = vld [vmem:[#allocation13 + $0x8] sm:$0xff] }
  0x79   :  { %382 = vmatprep.subr.mxu1 %v146_v5  ;;  %283 = vmatmul.mubr.f32.vlgmr.msra.gmra.mxu0 %v153_v1  ;;  %v131_v42 = vld [vmem:[#allocation10 + $0x50] sm:$0xff]  ;;  %v536_v46 = vld [vmem:[#allocation13 + $0x18] sm:$0xff]  ;;  %v533_v51 = vld [vmem:[#allocation13] sm:$0xff] }
  0x7a   :  { %383 = vmatpush1.msra.mxu1 %v145_v6  ;;  %702 = vmatpush3.msra.mxu0 %v548_v8  ;;  %v127_v45 = vld [vmem:[#allocation10 + $0x30] sm:$0xff]  ;;  %v124_v47 = vld [vmem:[#allocation10 + $0x18] sm:$0xff]  ;;  %v506_v57 = vld [vmem:[%s1094_s7] sm:$0xf]  ;;  %v518_v8 = vsub.s32 2, %v509_v54  ;;  %s972_s7 = smov [#allocation15]  }
  0x7b   :  { %384 = vmatprep.subr.mxu1 %v142_v7  ;;  %703 = vmatprep.subr.mxu0 %v970_v0  ;;  %v123_v48 = vld [vmem:[#allocation10 + $0x10] sm:$0xff]  ;;  %v532_v52 = vld [vmem:[#allocation8] sm:$0xff]  ;;  %v511_v61 = vrot.slane %v506_v57, %v510_v56  ;;  %v515_v1 = vrot.slane %v506_v57, %v514_v58  ;;  %s663_s22 = sshll.u32 %s972_s7, 4  ;;  %s664_s22 = int_to_ptr.vmem [resolvable:$true] %s663_s22 }
  0x7c   :  { %385 = vmatpush1.msra.mxu1 %v141_v9  ;;  %704 = vmatpush3.msra.mxu0 %v547_v11  ;;  %v535_v49 = vld [vmem:[#allocation13 + $0x10] sm:$0xff]  ;;  %v522_v9 = vsub.s32 3, %v509_v54  ;;  %s907_s23 = scalar_lea.vmem %s664_s22, 128  ;;  %p912_p8 = scmp.lt.s32.totalorder %s664_s22, %s664_s22 }
  0x7d   :  { %386 = vmatprep.subr.mxu1 %v138_v10  ;;  %705 = vmatprep.subr.mxu0 %v970_v0  ;;  %v519_v10 = vrot.slane %v506_v57, %v518_v8  ;;  %p908_p7 = scmp.ne.s32.totalorder %s664_s22, %s907_s23  ;;  %p913_p9 = scmp.lt.s32.totalorder %s907_s23, %s907_s23 }
  0x7e   :  { %387 = vmatpush1.msra.mxu1 %v137_v12  ;;  %706 = vmatpush3.msra.mxu0 %v546_v14 }
  0x7f   :  { %388 = vmatprep.subr.mxu1 %v134_v13  ;;  %707 = vmatprep.subr.mxu0 %v970_v0  ;;  %v523_v13 = vrot.slane %v506_v57, %v522_v9  ;;  %p914_p10 = por %p913_p9, %p912_p8 }
  0x80   :  { %389 = vmatpush1.msra.mxu1 %v133_v15  ;;  %708 = vmatpush3.msra.mxu0 %v545_v17 }
  0x81   :  { %390 = vmatprep.subr.mxu1 %v130_v16  ;;  %709 = vmatprep.subr.mxu0 %v970_v0  ;;  %p915_p11 = pnand %p914_p10, %p908_p7 }
  0x82   :  { %391 = vmatpush1.msra.mxu1 %v129_v18  ;;  %710 = vmatpush3.msra.mxu0 %v544_v20 }
  0x83   :  { %392 = vmatprep.subr.mxu1 %v126_v19  ;;  %711 = vmatprep.subr.mxu0 %v970_v0 }
  0x84   :  { %393 = vmatpush1.msra.mxu1 %v125_v21  ;;  %428 = vmatprep.mubr.f32.mxu1 %v970_v0 }
  0x85   :  { %394 = vmatprep.subr.mxu1 %v122_v22  ;;  %712 = vmatpush3.msra.mxu0 %v543_v24 }
  0x86   :  { %395 = vmatpush1.msra.mxu1 %v121_v23  ;;  %713 = vmatprep.subr.mxu0 %v970_v0 }
  0x87   :  { %679 = vmatmul.mubr.msk.f32.vlgmr.msra.gmra.mxu1 %vm360_vm0, %v1059_v25  ;;  %451 = vmatprep.subr.mxu1 %v152_v26 }
  0x88   :  { %452 = vmatpush1.msra.mxu1 %v151_v27  ;;  %714 = vmatpush3.msra.mxu0 %v542_v28  ;;  %v639_v27 = vld [vmem:[#allocation7] sm:$0xff] }
  0x89   :  { %453 = vmatprep.subr.mxu1 %v148_v29  ;;  %715 = vmatprep.subr.mxu0 %v970_v0 }
  0x8a   :  { %454 = vmatpush1.msra.mxu1 %v147_v30  ;;  %716 = vmatpush3.msra.mxu0 %v541_v31 }
  0x8b   :  { %455 = vmatprep.subr.mxu1 %v144_v32  ;;  %717 = vmatprep.subr.mxu0 %v970_v0 }
  0x8c   :  { %456 = vmatpush1.msra.mxu1 %v143_v33  ;;  %718 = vmatpush3.msra.mxu0 %v540_v34 }
  0x8d   :  { %457 = vmatprep.subr.mxu1 %v140_v35  ;;  %719 = vmatprep.subr.mxu0 %v970_v0 }
  0x8e   :  { %458 = vmatpush1.msra.mxu1 %v139_v36  ;;  %720 = vmatpush3.msra.mxu0 %v539_v37 }
  0x8f   :  { %459 = vmatprep.subr.mxu1 %v136_v38  ;;  %721 = vmatprep.subr.mxu0 %v970_v0 }
  0x90   :  { %460 = vmatpush1.msra.mxu1 %v135_v39  ;;  %722 = vmatpush3.msra.mxu0 %v538_v40 }
  0x91   :  { %461 = vmatprep.subr.mxu1 %v132_v41  ;;  %723 = vmatprep.subr.mxu0 %v970_v0 }
  0x92   :  { %462 = vmatpush1.msra.mxu1 %v131_v42  ;;  %724 = vmatpush3.msra.mxu0 %v537_v43 }
  0x93   :  { %463 = vmatprep.subr.mxu1 %v128_v44  ;;  %725 = vmatprep.subr.mxu0 %v970_v0 }
  0x94   :  { %464 = vmatpush1.msra.mxu1 %v127_v45  ;;  %726 = vmatpush3.msra.mxu0 %v536_v46 }
  0x95   :  { %465 = vmatprep.subr.mxu1 %v124_v47  ;;  %727 = vmatprep.subr.mxu0 %v970_v0 }
  0x96   :  { %466 = vmatpush1.msra.mxu1 %v123_v48  ;;  %499 = vmatprep.mubr.f32.mxu1 %v970_v0 }
  0x97   :  { %728 = vmatpush3.msra.mxu0 %v535_v49  ;;  %680 = vmatmul.mubr.msk.f32.vlgmr.msra.gmra.mxu1 %vm360_vm0, %v1059_v25 }
  0x98   :  { %729 = vmatprep.subr.mxu0 %v970_v0  ;;  %733 = vmatprep.mubr.msk.f32.mxu0 %vm971_vm1, %v970_v0 }
  0x99   :  { %730 = vmatpush3.msra.mxu0 %v534_v50 }
  0x9a   :  { %731 = vmatprep.subr.mxu0 %v970_v0 }
  0x9b   :  { %732 = vmatpush3.msra.mxu0 %v533_v51 }
  0x9c   :  { %734 = vmatmul.mubr.f32.vlgmr.msra.gmra.mxu0 %v532_v52 }
 0x137   :  { %v355_v55 = vpop.f32.mrf.mxu1 }
 0x139   :  { %v357_v59 = vpop.f32.mrf.mxu1  ;;  %v284_v60 = vpop.f32.mrf.mxu0 }
 0x13b   :  { %v286_v2 = vpop.f32.mrf.mxu0 }
 0x147   :  { %v430_v62 = vpop.f32.mrf.mxu1 }
 0x148   :  { %v431_v63 = vadd.f32 %v430_v62, %v284_v60 }
 0x149   :  { %v432_v3 = vpop.f32.mrf.mxu1 }
 0x14a   :  { %v528_v0 = vadd.f32 %v511_v61, %v431_v63  ;;  %v433_v4 = vadd.f32 %v432_v3, %v286_v2 }
 0x14c   :  { %v681_v5 = vmul.f32 -1.442695, %v528_v0  ;;  %v529_v6 = vadd.f32 %v515_v1, %v433_v4 }
 0x14e   :  { %751 = vpow2.f32 %v681_v5  ;;  %v682_v7 = vmul.f32 -1.442695, %v529_v6 }
 0x150   :  { %753 = vpow2.f32 %v682_v7 }
 0x157   :  { %v501_v11 = vpop.f32.mrf.mxu1 }
 0x158   :  { %v502_v12 = vadd.f32 %v501_v11, %v355_v55 }
 0x159   :  { %v503_v14 = vpop.f32.mrf.mxu1 }
 0x15a   :  { %v504_v16 = vadd.f32 %v503_v14, %v357_v59  ;;  %v530_v17 = vadd.f32 %v519_v10, %v502_v12 }
 0x15b   :  { %v752_v15 = vpop.eup %751 }
 0x15c   :  { %v622_v18 = vadd.f32 1.0, %v752_v15  ;;  %v615_v19 = vpop.f32.mrf.mxu0  ;;  %v531_v21 = vadd.f32 %v523_v13, %v504_v16 }
 0x15d   :  { %v754_v20 = vpop.eup %753  ;;  %v631_v22 = vadd.f32 %v615_v19, %v530_v17 }
 0x15e   :  { %755 = vrcp.f32 %v622_v18  ;;  %v628_v23 = vadd.f32 1.0, %v754_v20  ;;  %v735_v24 = vpop.f32.mrf.mxu0  ;;  %v683_v25 = vmul.f32 -1.442695, %v531_v21 }
 0x15f   :  { %757 = vtanh.f32 %v631_v22 }
 0x160   :  { %759 = vrcp.f32 %v628_v23 }
 0x161   :  { %761 = vpow2.f32 %v683_v25 }
 0x16b   :  { %v756_v26 = vpop.eup %755 }
 0x16c   :  { %v758_v28 = vpop.eup %757 }
 0x16d   :  { %v760_v29 = vpop.eup %759  ;;  %v641_v32 = vmul.f32 %v758_v28, %v756_v26 }
 0x16e   :  { %v762_v30 = vpop.eup %761  ;;  %v640_v31 = vmul.f32 %v760_v29, %v639_v27 }
 0x16f   :  { %v636_v33 = vadd.f32 1.0, %v762_v30 }
 0x170   :  { %v642_v34 = vadd.f32 %v641_v32, %v640_v31 }
 0x171   :  { %763 = vrcp.f32 %v636_v33 }
 0x172   :  { %646 = vst [vmem:[#allocation15] sm:$0xff] %v642_v34  ;;  %765 = vtanh.f32 %v642_v34 }
 0x173   :  { %918 = shalt.err (!%p915_p11)
}
 0x174   :  { %666 = dma.vmem_to_hbm [thread:$0]  %s664_s22, 128, %s1096_s9, [#allocation16]  }
 0x175   :  { %s973_s25 = smov [#allocation14]  }
 0x176   :  { %s653_s3 = sshll.u32 %s973_s25, 4  ;;  %s654_s3 = int_to_ptr.vmem [resolvable:$true] %s653_s3 }
 0x177   :  { %s927_s26 = scalar_lea.vmem %s654_s3, 128  ;;  %p932_p13 = scmp.lt.s32.totalorder %s654_s3, %s654_s3 }
 0x178   :  { %p928_p12 = scmp.ne.s32.totalorder %s654_s3, %s927_s26  ;;  %p933_p0 = scmp.lt.s32.totalorder %s927_s26, %s927_s26 }
 0x17a   :  { %p934_p1 = por %p933_p0, %p932_p13 }
 0x17c   :  { %p935_p2 = pnand %p934_p1, %p928_p12 }
 0x17e   :  { %v764_v35 = vpop.eup %763 }
 0x17f   :  { %v766_v36 = vpop.eup %765 }
 0x180   :  { %v644_v37 = vmul.f32 %v766_v36, %v764_v35 }
 0x182   :  { %645 = vst [vmem:[#allocation14] sm:$0xff] %v644_v37 }
 0x183   :  { %938 = shalt.err (!%p935_p2)
}
 0x184   :  { %656 = dma.vmem_to_hbm [thread:$0]  %s654_s3, 128, %s1095_s8, [#allocation4]  }
 0x185   :  { %955 = dma.done.wait [#allocation4], 128  }
 0x186   :  { %956 = vsyncadd [#allocation4], 4294967168 }
 0x187   :  { %957 = dma.done.wait [#allocation16], 128  }
 0x188   :  { %958 = vsyncadd [#allocation16], 4294967168 }
 0x189   :  { %673 = vsyncpa [#allocation3], 1 }
 0x18a   :  { %674 = vsyncpa [#allocation6], 1 }
 0x18b   :  { %675 = vsyncpa [#allocation9], 1 }
 0x18c   :  { %676 = vsyncpa [#allocation12], 1 }
 0x18d   :  { %677 = vsyncpa [#allocation4], 1 }
 0x18e   :  { %678 = vsyncpa [#allocation16], 1 }

</bundles_post_ra>
